<compile_context>
chip_gen: v7x
topology: tpu7x:2x2x1
jax: 0.10.0
libtpu: 0.0.40
codegen_flags: <defaults>
</compile_context>

<pallas_src>
import functools

import jax
import jax.numpy as jnp
import numpy as np
from jax import lax
from jax.experimental import pallas as pl
from jax.experimental.pallas import tpu as pltpu

THRESHOLD = 0.5
_LANE = 128
_SUBLANE = 8


def _round_up(v, m):
    return (v + m - 1) // m * m


def _cascade_kernel(x_ref, w1_ref, b1_ref, w2_ref, b2_ref, x1_ref, x2_ref,
                    *, logit_cutoff):
    # x_ref : (C,  ps, 128) VMEM  -- channel rows are full sublane x lane slabs
    # w1_ref: (C1, C) SMEM, b1_ref: (C1,) SMEM
    # w2_ref: (C2, C) SMEM, b2_ref: (C2,) SMEM
    # x1_ref: (C1, ps, 128) VMEM, x2_ref: (C2, ps, 128) VMEM
    C = x_ref.shape[0]
    C1 = x1_ref.shape[0]
    C2 = x2_ref.shape[0]
    ps = x_ref.shape[1]

    # Hoist the tiny weight/bias tables out of the pixel loop (~40 SMEM scalar
    # loads once per grid step).
    w1s = [[w1_ref[o, c] for c in range(C)] for o in range(C1)]
    b1s = [b1_ref[o] for o in range(C1)]
    w2s = [[w2_ref[o, c] for c in range(C)] for o in range(C2)]
    b2s = [b2_ref[o] for o in range(C2)]

    # Sublane chunking keeps live temporaries to a few tens of vregs (no
    # spills) while the per-grid-step DMA block stays large.
    if ps % 32 == 0:
        chunk = 32
    elif ps % _SUBLANE == 0:
        chunk = _SUBLANE
    else:
        chunk = ps
    n_chunks = ps // chunk

    def do_chunk(s):
        rows = pl.ds(s, chunk)
        xr = [x_ref[c, rows, :] for c in range(C)]          # (chunk, 128) slabs

        # ---- model1 (1x1 conv) + cascade mask -----------------------------
        def mix1(o):
            acc = xr[0] * w1s[o][0]
            for cin in range(1, C):
                acc = acc + xr[cin] * w1s[o][cin]
            return acc + b1s[o]

        if C1 == 1:
            acc = mix1(0)
            x1_ref[0, rows, :] = acc
            # sigmoid(acc) > threshold  <=>  acc > logit(threshold)  (exact)
            mask = (acc > logit_cutoff).astype(acc.dtype)
            # keep the multiply (not a select) to match PyTorch NaN semantics
            xm = [xr[c] * mask for c in range(C)]
        else:  # C1 == C: per-channel mask
            xm = []
            for o in range(C1):
                acc = mix1(o)
                x1_ref[o, rows, :] = acc
                mask = (acc > logit_cutoff).astype(acc.dtype)
                xm.append(xr[o] * mask)

        # ---- model2 (1x1 conv) on the masked input ------------------------
        for o in range(C2):
            acc = xm[0] * w2s[o][0]
            for cin in range(1, C):
                acc = acc + xm[cin] * w2s[o][cin]
            x2_ref[o, rows, :] = acc + b2s[o]

    if n_chunks == 1:
        do_chunk(0)
    else:
        def body(i, carry):
            do_chunk(pl.multiple_of(i * chunk, chunk))
            return carry
        lax.fori_loop(0, n_chunks, body, None)


def _choose_ps(R, N, c_total, ps_default):
    """Pick rows-of-128-pixels per grid step."""
    # Cap the in+out block at ~4 MiB so the double-buffered footprint (~8 MiB)
    # fits v5e's 16 MiB and v6e/v7x's 32 MiB default scoped-VMEM limits.
    budget_bytes = 4 << 20
    max_ps = max(_SUBLANE,
                 (budget_bytes // (c_total * _LANE * 4)) // _SUBLANE * _SUBLANE)
    ps = min(ps_default, max_ps)
    if R <= ps:
        ps = R
        if N == 1 and R >= 2 * _SUBLANE:
            # v7x has 2 TensorCores: give the "parallel" grid >= 2 steps.
            ps = _round_up((R + 1) // 2, _SUBLANE)
    return ps


def cascade_forward(x_nchw, w1, b1, w2, b2, *, threshold=THRESHOLD,
                    ps_default=512):
    """x_nchw: (N, C, H, W) float32.
    w1: (C1, C), b1: (C1,), w2: (C2, C), b2: (C2,) (PyTorch 1x1-conv layout)."""
    N, C, H, W = x_nchw.shape
    C1 = w1.shape[0]
    C2 = w2.shape[0]
    assert w1.shape == (C1, C) and w2.shape == (C2, C)
    assert b1.shape == (C1,) and b2.shape == (C2,)
    # PyTorch `x * mask` broadcasting: per-channel (C1 == C) or shared (C1 == 1)
    assert C1 == C or C1 == 1
    assert 0.0 < threshold < 1.0
    # Exact for the sigmoid activation (strictly monotone):
    #   sigmoid(x1) > t  <=>  x1 > log(t / (1 - t))
    logit_cutoff = float(np.log(threshold / (1.0 - threshold)))

    P = H * W
    P_pad = _round_up(P, _LANE)
    x3 = x_nchw.reshape(N, C, P)                  # NCHW -> (N,C,P): free reshape
    if P_pad != P:
        # Minimal pad only to a lane multiple (no full-tile round-up).
        x3 = jnp.pad(x3, ((0, 0), (0, 0), (0, P_pad - P)))
    R = P_pad // _LANE
    x4 = x3.reshape(N, C, R, _LANE)               # fold pixels onto sublanes (free)

    ps = _choose_ps(R, N, C + C1 + C2, ps_default)
    grid = (N, pl.cdiv(R, ps))

    kernel = functools.partial(_cascade_kernel, logit_cutoff=logit_cutoff)

    x1_4d, x2_4d = pl.pallas_call(
        kernel,
        out_shape=(
            jax.ShapeDtypeStruct((N, C1, R, _LANE), jnp.float32),
            jax.ShapeDtypeStruct((N, C2, R, _LANE), jnp.float32),
        ),
        grid=grid,
        in_specs=[
            # x block: batch squeezed, full channel axis, (ps, 128) pixel tile
            pl.BlockSpec((None, C, ps, _LANE), lambda n, p: (n, 0, p, 0)),
            # tiny weights / biases live in SMEM as scalars
            pl.BlockSpec(memory_space=pltpu.MemorySpace.SMEM),
            pl.BlockSpec(memory_space=pltpu.MemorySpace.SMEM),
            pl.BlockSpec(memory_space=pltpu.MemorySpace.SMEM),
            pl.BlockSpec(memory_space=pltpu.MemorySpace.SMEM),
        ],
        out_specs=(
            pl.BlockSpec((None, C1, ps, _LANE), lambda n, p: (n, 0, p, 0)),
            pl.BlockSpec((None, C2, ps, _LANE), lambda n, p: (n, 0, p, 0)),
        ),
        compiler_params=pltpu.CompilerParams(
            dimension_semantics=("parallel", "parallel"),
        ),
    )(x4, w1, b1, w2, b2)

    # Drop lane padding (identity when H*W % 128 == 0); reshape back to NCHW.
    x1 = x1_4d.reshape(N, C1, P_pad)[:, :, :P].reshape(N, C1, H, W)
    x2 = x2_4d.reshape(N, C2, P_pad)[:, :, :P].reshape(N, C2, H, W)
    return x1, x2


def _reference_forward(x_nchw, w1, b1, w2, b2, threshold=THRESHOLD):
    """Pure-JAX reference mirroring the PyTorch forward (NCHW 1x1 convs)."""
    x1 = jnp.einsum('oc,nchw->nohw', w1, x_nchw) + b1[None, :, None, None]
    mask = (jax.nn.sigmoid(x1) > threshold).astype(x_nchw.dtype)
    xm = x_nchw * mask
    x2 = jnp.einsum('oc,nchw->nohw', w2, xm) + b2[None, :, None, None]
    return x1, x2


if __name__ == "__main__":
    # Small shapes consistent with the module's NCHW conv-style forward.
    N, C, H, W = 2, 4, 16, 16       # batch=2, channels=4, spatial=16
    C1, C2 = 4, 4                   # model1 / model2 output channels

    key = jax.random.PRNGKey(0)
    kx, kw1, kb1, kw2, kb2 = jax.random.split(key, 5)

    x = jax.random.normal(kx, (N, C, H, W), dtype=jnp.float32)

    # Deterministic "model1" / "model2" parameters (1x1 conv weights in
    # PyTorch (Cout, Cin) layout + (Cout,) biases).
    w1 = jax.random.normal(kw1, (C1, C), dtype=jnp.float32) * 0.5
    b1 = jax.random.normal(kb1, (C1,), dtype=jnp.float32) * 0.1
    w2 = jax.random.normal(kw2, (C2, C), dtype=jnp.float32) * 0.5
    b2 = jax.random.normal(kb2, (C2,), dtype=jnp.float32) * 0.1

    x1_out, x2_out = cascade_forward(x, w1, b1, w2, b2)
    jax.block_until_ready((x1_out, x2_out))

    # Correctness check against the pure-JAX reference.
    x1_ref, x2_ref = _reference_forward(x, w1, b1, w2, b2)
    np.testing.assert_allclose(np.asarray(x1_out), np.asarray(x1_ref),
                               rtol=1e-5, atol=1e-5)
    np.testing.assert_allclose(np.asarray(x2_out), np.asarray(x2_ref),
                               rtol=1e-5, atol=1e-5)

    print("KERNEL_OK")
</pallas_src>

<mosaic_0001>
module attributes {stable_mosaic.version = 11 : i64} {
  func.func @_cascade_kernel(%arg0: i32, %arg1: i32, %arg2: memref<1x4x2x128xf32, #tpu.memory_space<vmem>>, %arg3: memref<4x4xf32, #tpu.memory_space<smem>>, %arg4: memref<4xf32, #tpu.memory_space<smem>>, %arg5: memref<4x4xf32, #tpu.memory_space<smem>>, %arg6: memref<4xf32, #tpu.memory_space<smem>>, %arg7: memref<1x4x2x128xf32, #tpu.memory_space<vmem>>, %arg8: memref<1x4x2x128xf32, #tpu.memory_space<vmem>>) attributes {dimension_semantics = [#tpu.dimension_semantics<parallel>, #tpu.dimension_semantics<parallel>], iteration_bounds = array<i64: 2, 1>, scalar_prefetch = 0 : i64, scratch_operands = 0 : i64, tpu.core_type = #tpu.core_type<tc>, window_params = [{transform_indices = @transform_0, window_bounds = array<i64: 1, 4, 2, 128>}, {transform_indices = @transform_1, window_bounds = array<i64: 4, 4>}, {transform_indices = @transform_2, window_bounds = array<i64: 4>}, {transform_indices = @transform_3, window_bounds = array<i64: 4, 4>}, {transform_indices = @transform_4, window_bounds = array<i64: 4>}, {transform_indices = @transform_5, window_bounds = array<i64: 1, 4, 2, 128>}, {transform_indices = @transform_6, window_bounds = array<i64: 1, 4, 2, 128>}]} {
    %c0 = arith.constant 0 : index
    %c0_0 = arith.constant 0 : index
    %0 = memref.load %arg3[%c0, %c0_0] : memref<4x4xf32, #tpu.memory_space<smem>>
    %c0_1 = arith.constant 0 : index
    %c1 = arith.constant 1 : index
    %1 = memref.load %arg3[%c0_1, %c1] : memref<4x4xf32, #tpu.memory_space<smem>>
    %c0_2 = arith.constant 0 : index
    %c2 = arith.constant 2 : index
    %2 = memref.load %arg3[%c0_2, %c2] : memref<4x4xf32, #tpu.memory_space<smem>>
    %c0_3 = arith.constant 0 : index
    %c3 = arith.constant 3 : index
    %3 = memref.load %arg3[%c0_3, %c3] : memref<4x4xf32, #tpu.memory_space<smem>>
    %c1_4 = arith.constant 1 : index
    %c0_5 = arith.constant 0 : index
    %4 = memref.load %arg3[%c1_4, %c0_5] : memref<4x4xf32, #tpu.memory_space<smem>>
    %c1_6 = arith.constant 1 : index
    %c1_7 = arith.constant 1 : index
    %5 = memref.load %arg3[%c1_6, %c1_7] : memref<4x4xf32, #tpu.memory_space<smem>>
    %c1_8 = arith.constant 1 : index
    %c2_9 = arith.constant 2 : index
    %6 = memref.load %arg3[%c1_8, %c2_9] : memref<4x4xf32, #tpu.memory_space<smem>>
    %c1_10 = arith.constant 1 : index
    %c3_11 = arith.constant 3 : index
    %7 = memref.load %arg3[%c1_10, %c3_11] : memref<4x4xf32, #tpu.memory_space<smem>>
    %c2_12 = arith.constant 2 : index
    %c0_13 = arith.constant 0 : index
    %8 = memref.load %arg3[%c2_12, %c0_13] : memref<4x4xf32, #tpu.memory_space<smem>>
    %c2_14 = arith.constant 2 : index
    %c1_15 = arith.constant 1 : index
    %9 = memref.load %arg3[%c2_14, %c1_15] : memref<4x4xf32, #tpu.memory_space<smem>>
    %c2_16 = arith.constant 2 : index
    %c2_17 = arith.constant 2 : index
    %10 = memref.load %arg3[%c2_16, %c2_17] : memref<4x4xf32, #tpu.memory_space<smem>>
    %c2_18 = arith.constant 2 : index
    %c3_19 = arith.constant 3 : index
    %11 = memref.load %arg3[%c2_18, %c3_19] : memref<4x4xf32, #tpu.memory_space<smem>>
    %c3_20 = arith.constant 3 : index
    %c0_21 = arith.constant 0 : index
    %12 = memref.load %arg3[%c3_20, %c0_21] : memref<4x4xf32, #tpu.memory_space<smem>>
    %c3_22 = arith.constant 3 : index
    %c1_23 = arith.constant 1 : index
    %13 = memref.load %arg3[%c3_22, %c1_23] : memref<4x4xf32, #tpu.memory_space<smem>>
    %c3_24 = arith.constant 3 : index
    %c2_25 = arith.constant 2 : index
    %14 = memref.load %arg3[%c3_24, %c2_25] : memref<4x4xf32, #tpu.memory_space<smem>>
    %c3_26 = arith.constant 3 : index
    %c3_27 = arith.constant 3 : index
    %15 = memref.load %arg3[%c3_26, %c3_27] : memref<4x4xf32, #tpu.memory_space<smem>>
    %c0_28 = arith.constant 0 : index
    %16 = memref.load %arg4[%c0_28] : memref<4xf32, #tpu.memory_space<smem>>
    %c1_29 = arith.constant 1 : index
    %17 = memref.load %arg4[%c1_29] : memref<4xf32, #tpu.memory_space<smem>>
    %c2_30 = arith.constant 2 : index
    %18 = memref.load %arg4[%c2_30] : memref<4xf32, #tpu.memory_space<smem>>
    %c3_31 = arith.constant 3 : index
    %19 = memref.load %arg4[%c3_31] : memref<4xf32, #tpu.memory_space<smem>>
    %c0_32 = arith.constant 0 : index
    %c0_33 = arith.constant 0 : index
    %20 = memref.load %arg5[%c0_32, %c0_33] : memref<4x4xf32, #tpu.memory_space<smem>>
    %c0_34 = arith.constant 0 : index
    %c1_35 = arith.constant 1 : index
    %21 = memref.load %arg5[%c0_34, %c1_35] : memref<4x4xf32, #tpu.memory_space<smem>>
    %c0_36 = arith.constant 0 : index
    %c2_37 = arith.constant 2 : index
    %22 = memref.load %arg5[%c0_36, %c2_37] : memref<4x4xf32, #tpu.memory_space<smem>>
    %c0_38 = arith.constant 0 : index
    %c3_39 = arith.constant 3 : index
    %23 = memref.load %arg5[%c0_38, %c3_39] : memref<4x4xf32, #tpu.memory_space<smem>>
    %c1_40 = arith.constant 1 : index
    %c0_41 = arith.constant 0 : index
    %24 = memref.load %arg5[%c1_40, %c0_41] : memref<4x4xf32, #tpu.memory_space<smem>>
    %c1_42 = arith.constant 1 : index
    %c1_43 = arith.constant 1 : index
    %25 = memref.load %arg5[%c1_42, %c1_43] : memref<4x4xf32, #tpu.memory_space<smem>>
    %c1_44 = arith.constant 1 : index
    %c2_45 = arith.constant 2 : index
    %26 = memref.load %arg5[%c1_44, %c2_45] : memref<4x4xf32, #tpu.memory_space<smem>>
    %c1_46 = arith.constant 1 : index
    %c3_47 = arith.constant 3 : index
    %27 = memref.load %arg5[%c1_46, %c3_47] : memref<4x4xf32, #tpu.memory_space<smem>>
    %c2_48 = arith.constant 2 : index
    %c0_49 = arith.constant 0 : index
    %28 = memref.load %arg5[%c2_48, %c0_49] : memref<4x4xf32, #tpu.memory_space<smem>>
    %c2_50 = arith.constant 2 : index
    %c1_51 = arith.constant 1 : index
    %29 = memref.load %arg5[%c2_50, %c1_51] : memref<4x4xf32, #tpu.memory_space<smem>>
    %c2_52 = arith.constant 2 : index
    %c2_53 = arith.constant 2 : index
    %30 = memref.load %arg5[%c2_52, %c2_53] : memref<4x4xf32, #tpu.memory_space<smem>>
    %c2_54 = arith.constant 2 : index
    %c3_55 = arith.constant 3 : index
    %31 = memref.load %arg5[%c2_54, %c3_55] : memref<4x4xf32, #tpu.memory_space<smem>>
    %c3_56 = arith.constant 3 : index
    %c0_57 = arith.constant 0 : index
    %32 = memref.load %arg5[%c3_56, %c0_57] : memref<4x4xf32, #tpu.memory_space<smem>>
    %c3_58 = arith.constant 3 : index
    %c1_59 = arith.constant 1 : index
    %33 = memref.load %arg5[%c3_58, %c1_59] : memref<4x4xf32, #tpu.memory_space<smem>>
    %c3_60 = arith.constant 3 : index
    %c2_61 = arith.constant 2 : index
    %34 = memref.load %arg5[%c3_60, %c2_61] : memref<4x4xf32, #tpu.memory_space<smem>>
    %c3_62 = arith.constant 3 : index
    %c3_63 = arith.constant 3 : index
    %35 = memref.load %arg5[%c3_62, %c3_63] : memref<4x4xf32, #tpu.memory_space<smem>>
    %c0_64 = arith.constant 0 : index
    %36 = memref.load %arg6[%c0_64] : memref<4xf32, #tpu.memory_space<smem>>
    %c1_65 = arith.constant 1 : index
    %37 = memref.load %arg6[%c1_65] : memref<4xf32, #tpu.memory_space<smem>>
    %c2_66 = arith.constant 2 : index
    %38 = memref.load %arg6[%c2_66] : memref<4xf32, #tpu.memory_space<smem>>
    %c3_67 = arith.constant 3 : index
    %39 = memref.load %arg6[%c3_67] : memref<4xf32, #tpu.memory_space<smem>>
    %c0_68 = arith.constant 0 : index
    %c0_69 = arith.constant 0 : index
    %c0_70 = arith.constant 0 : index
    %c0_71 = arith.constant 0 : index
    %40 = vector.load %arg2[%c0_68, %c0_69, %c0_70, %c0_71] : memref<1x4x2x128xf32, #tpu.memory_space<vmem>>, vector<1x1x2x128xf32>
    %41 = vector.shape_cast %40 : vector<1x1x2x128xf32> to vector<2x128xf32>
    %c0_72 = arith.constant 0 : index
    %c1_73 = arith.constant 1 : index
    %c0_74 = arith.constant 0 : index
    %c0_75 = arith.constant 0 : index
    %42 = vector.load %arg2[%c0_72, %c1_73, %c0_74, %c0_75] : memref<1x4x2x128xf32, #tpu.memory_space<vmem>>, vector<1x1x2x128xf32>
    %43 = vector.shape_cast %42 : vector<1x1x2x128xf32> to vector<2x128xf32>
    %c0_76 = arith.constant 0 : index
    %c2_77 = arith.constant 2 : index
    %c0_78 = arith.constant 0 : index
    %c0_79 = arith.constant 0 : index
    %44 = vector.load %arg2[%c0_76, %c2_77, %c0_78, %c0_79] : memref<1x4x2x128xf32, #tpu.memory_space<vmem>>, vector<1x1x2x128xf32>
    %45 = vector.shape_cast %44 : vector<1x1x2x128xf32> to vector<2x128xf32>
    %c0_80 = arith.constant 0 : index
    %c3_81 = arith.constant 3 : index
    %c0_82 = arith.constant 0 : index
    %c0_83 = arith.constant 0 : index
    %46 = vector.load %arg2[%c0_80, %c3_81, %c0_82, %c0_83] : memref<1x4x2x128xf32, #tpu.memory_space<vmem>>, vector<1x1x2x128xf32>
    %47 = vector.shape_cast %46 : vector<1x1x2x128xf32> to vector<2x128xf32>
    %48 = vector.broadcast %0 : f32 to vector<2x128xf32>
    %49 = arith.mulf %41, %48 : vector<2x128xf32>
    %50 = vector.broadcast %1 : f32 to vector<2x128xf32>
    %51 = arith.mulf %43, %50 : vector<2x128xf32>
    %52 = arith.addf %49, %51 : vector<2x128xf32>
    %53 = vector.broadcast %2 : f32 to vector<2x128xf32>
    %54 = arith.mulf %45, %53 : vector<2x128xf32>
    %55 = arith.addf %52, %54 : vector<2x128xf32>
    %56 = vector.broadcast %3 : f32 to vector<2x128xf32>
    %57 = arith.mulf %47, %56 : vector<2x128xf32>
    %58 = arith.addf %55, %57 : vector<2x128xf32>
    %59 = vector.broadcast %16 : f32 to vector<2x128xf32>
    %60 = arith.addf %58, %59 : vector<2x128xf32>
    %c0_84 = arith.constant 0 : index
    %c0_85 = arith.constant 0 : index
    %c0_86 = arith.constant 0 : index
    %c0_87 = arith.constant 0 : index
    %61 = vector.load %arg7[%c0_84, %c0_85, %c0_86, %c0_87] : memref<1x4x2x128xf32, #tpu.memory_space<vmem>>, vector<1x1x2x128xf32>
    %62 = vector.shape_cast %61 : vector<1x1x2x128xf32> to vector<2x128xf32>
    %63 = vector.shape_cast %60 : vector<2x128xf32> to vector<1x1x2x128xf32>
    tpu.vector_store %arg7[%c0_84, %c0_85, %c0_86, %c0_87], %63 {strides = array<i32>} : memref<1x4x2x128xf32, #tpu.memory_space<vmem>>, vector<1x1x2x128xf32>,
    %cst = arith.constant 0.000000e+00 : f32
    %64 = vector.broadcast %cst : f32 to vector<2x128xf32>
    %65 = arith.cmpf ogt, %60, %64 : vector<2x128xf32>
    %66 = arith.extui %65 : vector<2x128xi1> to vector<2x128xi32>
    %67 = arith.sitofp %66 : vector<2x128xi32> to vector<2x128xf32>
    %68 = arith.mulf %41, %67 : vector<2x128xf32>
    %69 = vector.broadcast %4 : f32 to vector<2x128xf32>
    %70 = arith.mulf %41, %69 : vector<2x128xf32>
    %71 = vector.broadcast %5 : f32 to vector<2x128xf32>
    %72 = arith.mulf %43, %71 : vector<2x128xf32>
    %73 = arith.addf %70, %72 : vector<2x128xf32>
    %74 = vector.broadcast %6 : f32 to vector<2x128xf32>
    %75 = arith.mulf %45, %74 : vector<2x128xf32>
    %76 = arith.addf %73, %75 : vector<2x128xf32>
    %77 = vector.broadcast %7 : f32 to vector<2x128xf32>
    %78 = arith.mulf %47, %77 : vector<2x128xf32>
    %79 = arith.addf %76, %78 : vector<2x128xf32>
    %80 = vector.broadcast %17 : f32 to vector<2x128xf32>
    %81 = arith.addf %79, %80 : vector<2x128xf32>
    %c0_88 = arith.constant 0 : index
    %c1_89 = arith.constant 1 : index
    %c0_90 = arith.constant 0 : index
    %c0_91 = arith.constant 0 : index
    %82 = vector.load %arg7[%c0_88, %c1_89, %c0_90, %c0_91] : memref<1x4x2x128xf32, #tpu.memory_space<vmem>>, vector<1x1x2x128xf32>
    %83 = vector.shape_cast %82 : vector<1x1x2x128xf32> to vector<2x128xf32>
    %84 = vector.shape_cast %81 : vector<2x128xf32> to vector<1x1x2x128xf32>
    tpu.vector_store %arg7[%c0_88, %c1_89, %c0_90, %c0_91], %84 {strides = array<i32>} : memref<1x4x2x128xf32, #tpu.memory_space<vmem>>, vector<1x1x2x128xf32>,
    %cst_92 = arith.constant 0.000000e+00 : f32
    %85 = vector.broadcast %cst_92 : f32 to vector<2x128xf32>
    %86 = arith.cmpf ogt, %81, %85 : vector<2x128xf32>
    %87 = arith.extui %86 : vector<2x128xi1> to vector<2x128xi32>
    %88 = arith.sitofp %87 : vector<2x128xi32> to vector<2x128xf32>
    %89 = arith.mulf %43, %88 : vector<2x128xf32>
    %90 = vector.broadcast %8 : f32 to vector<2x128xf32>
    %91 = arith.mulf %41, %90 : vector<2x128xf32>
    %92 = vector.broadcast %9 : f32 to vector<2x128xf32>
    %93 = arith.mulf %43, %92 : vector<2x128xf32>
    %94 = arith.addf %91, %93 : vector<2x128xf32>
    %95 = vector.broadcast %10 : f32 to vector<2x128xf32>
    %96 = arith.mulf %45, %95 : vector<2x128xf32>
    %97 = arith.addf %94, %96 : vector<2x128xf32>
    %98 = vector.broadcast %11 : f32 to vector<2x128xf32>
    %99 = arith.mulf %47, %98 : vector<2x128xf32>
    %100 = arith.addf %97, %99 : vector<2x128xf32>
    %101 = vector.broadcast %18 : f32 to vector<2x128xf32>
    %102 = arith.addf %100, %101 : vector<2x128xf32>
    %c0_93 = arith.constant 0 : index
    %c2_94 = arith.constant 2 : index
    %c0_95 = arith.constant 0 : index
    %c0_96 = arith.constant 0 : index
    %103 = vector.load %arg7[%c0_93, %c2_94, %c0_95, %c0_96] : memref<1x4x2x128xf32, #tpu.memory_space<vmem>>, vector<1x1x2x128xf32>
    %104 = vector.shape_cast %103 : vector<1x1x2x128xf32> to vector<2x128xf32>
    %105 = vector.shape_cast %102 : vector<2x128xf32> to vector<1x1x2x128xf32>
    tpu.vector_store %arg7[%c0_93, %c2_94, %c0_95, %c0_96], %105 {strides = array<i32>} : memref<1x4x2x128xf32, #tpu.memory_space<vmem>>, vector<1x1x2x128xf32>,
    %cst_97 = arith.constant 0.000000e+00 : f32
    %106 = vector.broadcast %cst_97 : f32 to vector<2x128xf32>
    %107 = arith.cmpf ogt, %102, %106 : vector<2x128xf32>
    %108 = arith.extui %107 : vector<2x128xi1> to vector<2x128xi32>
    %109 = arith.sitofp %108 : vector<2x128xi32> to vector<2x128xf32>
    %110 = arith.mulf %45, %109 : vector<2x128xf32>
    %111 = vector.broadcast %12 : f32 to vector<2x128xf32>
    %112 = arith.mulf %41, %111 : vector<2x128xf32>
    %113 = vector.broadcast %13 : f32 to vector<2x128xf32>
    %114 = arith.mulf %43, %113 : vector<2x128xf32>
    %115 = arith.addf %112, %114 : vector<2x128xf32>
    %116 = vector.broadcast %14 : f32 to vector<2x128xf32>
    %117 = arith.mulf %45, %116 : vector<2x128xf32>
    %118 = arith.addf %115, %117 : vector<2x128xf32>
    %119 = vector.broadcast %15 : f32 to vector<2x128xf32>
    %120 = arith.mulf %47, %119 : vector<2x128xf32>
    %121 = arith.addf %118, %120 : vector<2x128xf32>
    %122 = vector.broadcast %19 : f32 to vector<2x128xf32>
    %123 = arith.addf %121, %122 : vector<2x128xf32>
    %c0_98 = arith.constant 0 : index
    %c3_99 = arith.constant 3 : index
    %c0_100 = arith.constant 0 : index
    %c0_101 = arith.constant 0 : index
    %124 = vector.load %arg7[%c0_98, %c3_99, %c0_100, %c0_101] : memref<1x4x2x128xf32, #tpu.memory_space<vmem>>, vector<1x1x2x128xf32>
    %125 = vector.shape_cast %124 : vector<1x1x2x128xf32> to vector<2x128xf32>
    %126 = vector.shape_cast %123 : vector<2x128xf32> to vector<1x1x2x128xf32>
    tpu.vector_store %arg7[%c0_98, %c3_99, %c0_100, %c0_101], %126 {strides = array<i32>} : memref<1x4x2x128xf32, #tpu.memory_space<vmem>>, vector<1x1x2x128xf32>,
    %cst_102 = arith.constant 0.000000e+00 : f32
    %127 = vector.broadcast %cst_102 : f32 to vector<2x128xf32>
    %128 = arith.cmpf ogt, %123, %127 : vector<2x128xf32>
    %129 = arith.extui %128 : vector<2x128xi1> to vector<2x128xi32>
    %130 = arith.sitofp %129 : vector<2x128xi32> to vector<2x128xf32>
    %131 = arith.mulf %47, %130 : vector<2x128xf32>
    %132 = vector.broadcast %20 : f32 to vector<2x128xf32>
    %133 = arith.mulf %68, %132 : vector<2x128xf32>
    %134 = vector.broadcast %21 : f32 to vector<2x128xf32>
    %135 = arith.mulf %89, %134 : vector<2x128xf32>
    %136 = arith.addf %133, %135 : vector<2x128xf32>
    %137 = vector.broadcast %22 : f32 to vector<2x128xf32>
    %138 = arith.mulf %110, %137 : vector<2x128xf32>
    %139 = arith.addf %136, %138 : vector<2x128xf32>
    %140 = vector.broadcast %23 : f32 to vector<2x128xf32>
    %141 = arith.mulf %131, %140 : vector<2x128xf32>
    %142 = arith.addf %139, %141 : vector<2x128xf32>
    %143 = vector.broadcast %36 : f32 to vector<2x128xf32>
    %144 = arith.addf %142, %143 : vector<2x128xf32>
    %c0_103 = arith.constant 0 : index
    %c0_104 = arith.constant 0 : index
    %c0_105 = arith.constant 0 : index
    %c0_106 = arith.constant 0 : index
    %145 = vector.load %arg8[%c0_103, %c0_104, %c0_105, %c0_106] : memref<1x4x2x128xf32, #tpu.memory_space<vmem>>, vector<1x1x2x128xf32>
    %146 = vector.shape_cast %145 : vector<1x1x2x128xf32> to vector<2x128xf32>
    %147 = vector.shape_cast %144 : vector<2x128xf32> to vector<1x1x2x128xf32>
    tpu.vector_store %arg8[%c0_103, %c0_104, %c0_105, %c0_106], %147 {strides = array<i32>} : memref<1x4x2x128xf32, #tpu.memory_space<vmem>>, vector<1x1x2x128xf32>,
    %148 = vector.broadcast %24 : f32 to vector<2x128xf32>
    %149 = arith.mulf %68, %148 : vector<2x128xf32>
    %150 = vector.broadcast %25 : f32 to vector<2x128xf32>
    %151 = arith.mulf %89, %150 : vector<2x128xf32>
    %152 = arith.addf %149, %151 : vector<2x128xf32>
    %153 = vector.broadcast %26 : f32 to vector<2x128xf32>
    %154 = arith.mulf %110, %153 : vector<2x128xf32>
    %155 = arith.addf %152, %154 : vector<2x128xf32>
    %156 = vector.broadcast %27 : f32 to vector<2x128xf32>
    %157 = arith.mulf %131, %156 : vector<2x128xf32>
    %158 = arith.addf %155, %157 : vector<2x128xf32>
    %159 = vector.broadcast %37 : f32 to vector<2x128xf32>
    %160 = arith.addf %158, %159 : vector<2x128xf32>
    %c0_107 = arith.constant 0 : index
    %c1_108 = arith.constant 1 : index
    %c0_109 = arith.constant 0 : index
    %c0_110 = arith.constant 0 : index
    %161 = vector.load %arg8[%c0_107, %c1_108, %c0_109, %c0_110] : memref<1x4x2x128xf32, #tpu.memory_space<vmem>>, vector<1x1x2x128xf32>
    %162 = vector.shape_cast %161 : vector<1x1x2x128xf32> to vector<2x128xf32>
    %163 = vector.shape_cast %160 : vector<2x128xf32> to vector<1x1x2x128xf32>
    tpu.vector_store %arg8[%c0_107, %c1_108, %c0_109, %c0_110], %163 {strides = array<i32>} : memref<1x4x2x128xf32, #tpu.memory_space<vmem>>, vector<1x1x2x128xf32>,
    %164 = vector.broadcast %28 : f32 to vector<2x128xf32>
    %165 = arith.mulf %68, %164 : vector<2x128xf32>
    %166 = vector.broadcast %29 : f32 to vector<2x128xf32>
    %167 = arith.mulf %89, %166 : vector<2x128xf32>
    %168 = arith.addf %165, %167 : vector<2x128xf32>
    %169 = vector.broadcast %30 : f32 to vector<2x128xf32>
    %170 = arith.mulf %110, %169 : vector<2x128xf32>
    %171 = arith.addf %168, %170 : vector<2x128xf32>
    %172 = vector.broadcast %31 : f32 to vector<2x128xf32>
    %173 = arith.mulf %131, %172 : vector<2x128xf32>
    %174 = arith.addf %171, %173 : vector<2x128xf32>
    %175 = vector.broadcast %38 : f32 to vector<2x128xf32>
    %176 = arith.addf %174, %175 : vector<2x128xf32>
    %c0_111 = arith.constant 0 : index
    %c2_112 = arith.constant 2 : index
    %c0_113 = arith.constant 0 : index
    %c0_114 = arith.constant 0 : index
    %177 = vector.load %arg8[%c0_111, %c2_112, %c0_113, %c0_114] : memref<1x4x2x128xf32, #tpu.memory_space<vmem>>, vector<1x1x2x128xf32>
    %178 = vector.shape_cast %177 : vector<1x1x2x128xf32> to vector<2x128xf32>
    %179 = vector.shape_cast %176 : vector<2x128xf32> to vector<1x1x2x128xf32>
    tpu.vector_store %arg8[%c0_111, %c2_112, %c0_113, %c0_114], %179 {strides = array<i32>} : memref<1x4x2x128xf32, #tpu.memory_space<vmem>>, vector<1x1x2x128xf32>,
    %180 = vector.broadcast %32 : f32 to vector<2x128xf32>
    %181 = arith.mulf %68, %180 : vector<2x128xf32>
    %182 = vector.broadcast %33 : f32 to vector<2x128xf32>
    %183 = arith.mulf %89, %182 : vector<2x128xf32>
    %184 = arith.addf %181, %183 : vector<2x128xf32>
    %185 = vector.broadcast %34 : f32 to vector<2x128xf32>
    %186 = arith.mulf %110, %185 : vector<2x128xf32>
    %187 = arith.addf %184, %186 : vector<2x128xf32>
    %188 = vector.broadcast %35 : f32 to vector<2x128xf32>
    %189 = arith.mulf %131, %188 : vector<2x128xf32>
    %190 = arith.addf %187, %189 : vector<2x128xf32>
    %191 = vector.broadcast %39 : f32 to vector<2x128xf32>
    %192 = arith.addf %190, %191 : vector<2x128xf32>
    %c0_115 = arith.constant 0 : index
    %c3_116 = arith.constant 3 : index
    %c0_117 = arith.constant 0 : index
    %c0_118 = arith.constant 0 : index
    %193 = vector.load %arg8[%c0_115, %c3_116, %c0_117, %c0_118] : memref<1x4x2x128xf32, #tpu.memory_space<vmem>>, vector<1x1x2x128xf32>
    %194 = vector.shape_cast %193 : vector<1x1x2x128xf32> to vector<2x128xf32>
    %195 = vector.shape_cast %192 : vector<2x128xf32> to vector<1x1x2x128xf32>
    tpu.vector_store %arg8[%c0_115, %c3_116, %c0_117, %c0_118], %195 {strides = array<i32>} : memref<1x4x2x128xf32, #tpu.memory_space<vmem>>, vector<1x1x2x128xf32>,
    return
  }
  func.func @transform_0(%arg0: i32, %arg1: i32) -> (i32, i32, i32, i32) {
    %c0_i32 = arith.constant 0 : i32
    %c0_i32_0 = arith.constant 0 : i32
    %c0_i32_1 = arith.constant 0 : i32
    return %arg0, %c0_i32, %arg1, %c0_i32_0 : i32, i32, i32, i32
  }
  func.func @transform_1(%arg0: i32, %arg1: i32) -> (i32, i32) {
    %c0_i32 = arith.constant 0 : i32
    %c0_i32_0 = arith.constant 0 : i32
    %c0_i32_1 = arith.constant 0 : i32
    return %c0_i32, %c0_i32_0 : i32, i32
  }
  func.func @transform_2(%arg0: i32, %arg1: i32) -> i32 {
    %c0_i32 = arith.constant 0 : i32
    %c0_i32_0 = arith.constant 0 : i32
    return %c0_i32 : i32
  }
  func.func @transform_3(%arg0: i32, %arg1: i32) -> (i32, i32) {
    %c0_i32 = arith.constant 0 : i32
    %c0_i32_0 = arith.constant 0 : i32
    %c0_i32_1 = arith.constant 0 : i32
    return %c0_i32, %c0_i32_0 : i32, i32
  }
  func.func @transform_4(%arg0: i32, %arg1: i32) -> i32 {
    %c0_i32 = arith.constant 0 : i32
    %c0_i32_0 = arith.constant 0 : i32
    return %c0_i32 : i32
  }
  func.func @transform_5(%arg0: i32, %arg1: i32) -> (i32, i32, i32, i32) {
    %c0_i32 = arith.constant 0 : i32
    %c0_i32_0 = arith.constant 0 : i32
    %c0_i32_1 = arith.constant 0 : i32
    return %arg0, %c0_i32, %arg1, %c0_i32_0 : i32, i32, i32, i32
  }
  func.func @transform_6(%arg0: i32, %arg1: i32) -> (i32, i32, i32, i32) {
    %c0_i32 = arith.constant 0 : i32
    %c0_i32_0 = arith.constant 0 : i32
    %c0_i32_1 = arith.constant 0 : i32
    return %arg0, %c0_i32, %arg1, %c0_i32_0 : i32, i32, i32, i32
  }
}

</mosaic_0001>

<bundles_post_ra>
// kernel: tpu_custom_call.1
= control target key start
LH: loop header
LB: loop body
LE: loop exit
PB: predicated region body
PF: predicated region fallthrough
CT: control target
= control target key end

     0   :  { %s1642_s0 = inlined_call_operand.hbm [shape: f32[2,4,2,128], index: 0, kind: input, shape index: {}]   ;;  %s1643_s1 = inlined_call_operand.hbm [shape: f32[4,4], index: 1, kind: input, shape index: {}]   ;;  %s1644_s2 = inlined_call_operand.vmem [shape: f32[4], index: 2, kind: input, shape index: {}]   ;;  %s1645_s3 = inlined_call_operand.vmem [shape: f32[4,4], index: 3, kind: input, shape index: {}]   ;;  %s1646_s4 = inlined_call_operand.vmem [shape: f32[4], index: 4, kind: input, shape index: {}]   ;;  %s1647_s5 = inlined_call_operand.hbm [shape: f32[2,4,2,128], index: 5, kind: output, shape index: {0}]   ;;  %s1648_s6 = inlined_call_operand.hbm [shape: f32[2,4,2,128], index: 6, kind: output, shape index: {1}]  }
   0x1   :  { %1655 = sst [smem:[#allocation24_spill]] %s1642_s0 }
   0x2   :  { %1656 = sst [smem:[#allocation25_spill]] %s1643_s1 }
   0x3   :  { %1657 = sst [smem:[#allocation26_spill]] %s1644_s2 }
   0x4   :  { %1658 = sst [smem:[#allocation27_spill]] %s1645_s3 }
   0x5   :  { %1659 = sst [smem:[#allocation28_spill]] %s1646_s4 }
   0x6   :  { %12 = vsyncpa [#allocation3], 0 }
   0x7   :  { %14 = vsyncpa [#allocation3 + $0x1], 0 }
   0x8   :  { %15 = vsyncpa [#allocation5], 0 }
   0x9   :  { %16 = vsyncpa [#allocation6], 0 }
   0xa   :  { %17 = vsyncpa [#allocation10], 0 }
   0xb   :  { %18 = vsyncpa [#allocation4], 0 }
   0xc   :  { %20 = vsyncpa [#allocation4 + $0x1], 0 }
   0xd   :  { %21 = vsyncpa [#allocation14], 0 }
   0xe   :  { %23 = vsyncpa [#allocation14 + $0x1], 0  ;;  %s1185_s21 = smov 0   ;;  %s1187_s22 = smov 0  }
   0xf   :  { %s1189_s23 = smov 0   ;;  %s1191_s24 = smov 0  }
  0x10   :  { %s1193_s25 = smov 0   ;;  %s1195_s26 = smov 0  }
  0x11 LB: > { %1660 = sst [smem:[#allocation21_spill]] %s1132_s25  ;;  %s730_s27 = sadd.s32 4294967295, %s1136_s26   ;;  %s1136_s26 = sphi %s1195_s26, %s29_s26   ;;  %s1132_s25 = sphi %s1193_s25, %s1683_s25   ;;  %s1128_s24 = sphi %s1191_s24, %s1682_s24   ;;  %s1124_s23 = sphi %s1189_s23, %s1686_s23   ;;  %s1120_s22 = sphi %s1187_s22, %s1685_s22   ;;  %s1116_s21 = sphi %s1185_s21, %s1684_s21  }
  0x12   : > { %s731_s28 = sadd.s32 4294967294, %s1136_s26   ;;  %p63_p0 = scmp.ne.s32.totalorder %s1120_s22, %s1116_s21 }
  0x13   : > { %p1219_p1 = scmp.eq.s32.totalorder %s730_s27, 0  ;;  %p1223_p2 = scmp.eq.s32.totalorder %s730_s27, 1 }
  0x14   : > { %p179_p3 = scmp.eq.s32.totalorder %s731_s28, 1  ;;  %p732_p5 = scmp.ge.s32.totalorder %s1136_s26, 1 }
  0x15   : > { %s1661_s29 = scalar_select %p1219_p1, 1, 0 }
  0x16   : > { %p1229_p4 = por %p1219_p1, %p63_p0  ;;  %p1234_p6 = por %p179_p3, %p63_p0 }
  0x17   : > { %p214_p7 = scmp.lt.s32.totalorder %s1136_s26, 3  ;;  %s1665_s3 = sld [smem:[#allocation27_spill]] }
  0x18   : > { %s1663_s7 = scalar_select %p1229_p4, 1, 0 }
  0x19   : > { %s1664_s8 = scalar_select %p1234_p6, 1, 0 }
  0x1a   : > { %p1242_p8 = pnand %p732_p5, %p214_p7  ;;  %s1668_s2 = sld [smem:[#allocation26_spill]] }
  0x1b   : > { %s1669_s4 = sld [smem:[#allocation28_spill]] }
  0x1c   : > { %p831_p10 = pneg %p1242_p8 }
  0x1d   : > { %s247_s11 = sshll.u32 %s1665_s3, 4  ;;  %s248_s11 = int_to_ptr.vmem [resolvable:$true] %s247_s11 }
  0x1e   : > { %p1251_p11 = pnand %p831_p10, %p1219_p1  ;;  %s922_s20 = scalar_lea.vmem %s248_s11, 64 }
  0x1f   : > { %p923_p12 = scmp.ne.s32.totalorder %s248_s11, %s922_s20  ;;  %p930_p5 = scmp.lt.s32.totalorder %s248_s11, %s248_s11 }
  0x20   : > { %s236_s16 = sshll.u32 %s1668_s2, 4  ;;  %p924_p13 = pneg %p1251_p11  ;;  %s1258_s16 = int_to_ptr.vmem [resolvable:$true] %s236_s16 }
  0x21   : > { %s258_s19 = sshll.u32 %s1669_s4, 4  ;;  %p931_p7 = scmp.lt.s32.totalorder %s922_s20, %s922_s20  ;;  %s259_s19 = int_to_ptr.vmem [resolvable:$true] %s258_s19 }
  0x22   : > { %p925_p0 = pnand %p924_p13, %p923_p12 }
  0x23   : > { %p932_p10 = por %p931_p7, %p930_p5 }
  0x24   : > { %p926_p3 = pneg %p925_p0 }
  0x26   : > { %p933_p9 = pnand %p932_p10, %p926_p3 }
  0x28   : > { %936 = shalt.err (!%p933_p9)
}
  0x29   : > { %s1138_s27 = smov [#allocation9]   ;;  %s1670_s1 = sld [smem:[#allocation25_spill]] }
  0x2a   : > { %840 = dma.vmem_to_smem (!%p1251_p11), %s248_s11, 64, %s1138_s27, [#allocation10]  }
  0x2f   : > { %s937_s10 = scalar_lea.hbm %s1670_s1, 64 }
  0x30   : > { %p938_p6 = scmp.ne.s32.totalorder %s1670_s1, %s937_s10  ;;  %p944_p9 = scmp.lt.u32.totalorder %s937_s10, %s1670_s1 }
  0x32   : > { %p940_p12 = pnand %p938_p6, %p924_p13 }
  0x34   : > { %p941_p0 = pneg %p940_p12 }
  0x36   : > { %p946_p3 = pnand %p944_p9, %p941_p0 }
  0x38   : > { %949 = shalt.err (!%p946_p3)
}
  0x39   : > { %s1139_s20 = smov [#allocation7]   ;;  %s950_s28 = scalar_lea.vmem %s1258_s16, 16 }
  0x3a   : > { %834 = dma.hbm_to_smem (!%p1251_p11), %s1670_s1, 64, %s1139_s20, [#allocation5]  }
  0x3b   : > { %p951_p6 = scmp.ne.s32.totalorder %s1258_s16, %s950_s28  ;;  %p958_p10 = scmp.lt.s32.totalorder %s1258_s16, %s1258_s16 }
  0x3c   : > { %p959_p12 = scmp.lt.s32.totalorder %s950_s28, %s950_s28 }
  0x3d   : > { %p953_p5 = pnand %p951_p6, %p924_p13 }
  0x3e   : > { %p960_p0 = por %p959_p12, %p958_p10 }
  0x3f   : > { %p954_p7 = pneg %p953_p5 }
  0x41   : > { %p961_p9 = pnand %p960_p0, %p954_p7 }
  0x43   : > { %964 = shalt.err (!%p961_p9)
}
  0x44   : > { %s1140_s9 = smov [#allocation8]   ;;  %s965_s15 = scalar_lea.vmem %s259_s19, 16 }
  0x45   : > { %837 = dma.vmem_to_smem (!%p1251_p11), %s1258_s16, 16, %s1140_s9, [#allocation6]  }
  0x46   : > { %p966_p3 = scmp.ne.s32.totalorder %s259_s19, %s965_s15  ;;  %p973_p10 = scmp.lt.s32.totalorder %s259_s19, %s259_s19 }
  0x47   : > { %p974_p7 = scmp.lt.s32.totalorder %s965_s15, %s965_s15 }
  0x48   : > { %p968_p6 = pnand %p966_p3, %p924_p13 }
  0x49   : > { %p975_p12 = por %p974_p7, %p973_p10 }
  0x4a   : > { %p969_p5 = pneg %p968_p6 }
  0x4c   : > { %p976_p0 = pnand %p975_p12, %p969_p5 }
  0x4e   : > { %979 = shalt.err (!%p976_p0)
}
  0x4f   : > { %s1141_s17 = smov [#allocation11]   ;;  %s41_s16 = sadd.s32 1, %s1132_s25 }
  0x50   : > { %843 = dma.vmem_to_smem (!%p1251_p11), %s259_s19, 16, %s1141_s17, [#allocation10]  }
  0x51   : > { %s50_s18 = sadd.s32 1, %s1124_s23  ;;  %p43_p13 = scmp.ge.s32.totalorder %s41_s16, 2 }
  0x52   : > { %p57_p9 = scmp.ne.s32.totalorder %s1124_s23, %s1120_s22  ;;  %p58_p3 = scmp.eq.s32.totalorder %s1136_s26, 0 }
  0x53   : > { %p859_p6 = scmp.lt.s32.totalorder %s1136_s26, 2  ;;  %s1688_s16 = smov (%p43_p13, %s41_s16), 0 }
  0x54   : > { %1671 = sst [smem:[#allocation22_spill]] %s1688_s16  ;;  %p59_p5 = por %p58_p3, %p57_p9 }
  0x55   : > { %p1316_p10 = por %p1223_p2, %p57_p9  ;;  %s45_s20 = ssub.s32 %s1132_s25, %s1688_s16 }
  0x56   : > { %s269_s11 = sand.u32 1, %s1124_s23   ;;  %p48_p7 = scmp.eq.s32.totalorder %s45_s20, 0 }
  0x57   : > { %s1672_s13 = scalar_select %p1316_p10, 1, 0 }
  0x58   : > { %s738_s19 = sshll.u32 %s269_s11, 3  ;;  %s806_s27 = sshll.u32 %s1132_s25, 7 }
  0x59   : > { %s1325_s28 = scalar_select %p48_p7, %s1124_s23, %s50_s18  }
  0x5a   : > { %s1674_s0 = sld [smem:[#allocation24_spill]]  ;;  %s273_s30 = scalar_lea.vmem [#allocation2], %s738_s19 }
  0x5b   : > { %1673 = sst [smem:[#allocation23_spill]] %s1325_s28  ;;  %s281_s15 = sshll.u32 %s273_s30, 4  ;;  %s1338_s15 = int_to_ptr.vmem [resolvable:$true] %s281_s15 }
  0x5c   : > { %p1334_p2 = pnand %p859_p6, %p59_p5  ;;  %s1340_s18 = scalar_lea.sflag [#allocation3], %s269_s11 }
  0x5e   : > { %p982_p12 = pneg %p1334_p2 }
  0x60   : > { %s1330_s14 = scalar_lea.hbm %s1674_s0, %s806_s27  ;;  %s985_s9 = scalar_lea.hbm %s1674_s0, 256 }
  0x61   : > { %s980_s20 = scalar_lea.hbm %s1330_s14, 128  ;;  %p986_p9 = scmp.lt.u32.totalorder %s1330_s14, %s1674_s0 }
  0x62   : > { %p981_p11 = scmp.ne.s32.totalorder %s1330_s14, %s980_s20  ;;  %p987_p3 = scmp.lt.u32.totalorder %s985_s9, %s980_s20 }
  0x63   : > { %p989_p5 = scmp.lt.u32.totalorder %s980_s20, %s1330_s14 }
  0x64   : > { %p983_p0 = pnand %p982_p12, %p981_p11  ;;  %p988_p6 = por %p987_p3, %p986_p9 }
  0x66   : > { %p984_p13 = pneg %p983_p0  ;;  %p990_p7 = por %p989_p5, %p988_p6 }
  0x68   : > { %p991_p10 = pnand %p990_p7, %p984_p13 }
  0x6a   : > { %994 = shalt.err (!%p991_p10)
}
  0x6b   : > { %s995_s11 = scalar_lea.vmem %s1338_s15, 128  ;;  %s1142_s19 = smov [#allocation2]  }
  0x6c   : > { %p996_p11 = scmp.ne.s32.totalorder %s1338_s15, %s995_s11  ;;  %s1000_s27 = sshll.u32 %s1142_s19, 4  ;;  %s1001_s27 = int_to_ptr.vmem [resolvable:$false] %s1000_s27 }
  0x6d   : > { %s1002_s10 = scalar_lea.vmem %s1001_s27, 256  ;;  %p1003_p4 = scmp.lt.s32.totalorder %s1338_s15, %s1001_s27 }
  0x6e   : > { %p998_p0 = pnand %p996_p11, %p982_p12  ;;  %p1004_p9 = scmp.lt.s32.totalorder %s1002_s10, %s995_s11 }
  0x70   : > { %p999_p1 = pneg %p998_p0  ;;  %p1005_p3 = por %p1004_p9, %p1003_p4 }
  0x72   : > { %p1006_p6 = pnand %p1005_p3, %p999_p1 }
  0x74   : > { %1009 = shalt.err (!%p1006_p6)
}
  0x75   : > { %s1143_s20 = smov 32   ;;  %s1144_s9 = smov 2  }
  0x76   : > { %847 = dma.hbm_to_vmem [thread:$0]  (!%p1334_p2), %s1330_s14, 128, %s1338_s15, %s1340_s18, %s1143_s20, %s1143_s20, %s1144_s9  }
  0x77   : > { %293 = sbr.rel (%p1242_p8) target bundleno = 209 (0xd1), region = 40  ;;  %s1371_s30 = sand.u32 (!%p1242_p8), 1, %s1120_s22  }
  0x78   : > { %s1374_s11 = sshll.u32 (!%p1242_p8), %s1371_s30, 3  ;;  %s296_s19 = scalar_lea.sflag (!%p1242_p8), [#allocation3], %s1371_s30 }
  0x79   : > { %s299_s27 = scalar_lea.vmem (!%p1242_p8), [#allocation2], %s1374_s11  ;;  %p1676_p1 = scmp.ne.s32.totalorder (!%p1242_p8), %s1663_s7, 0 }
  0x7e   : > { %1091 = dma.done.wait (%p1676_p1), %s296_s19, 128  }
  0x7f   : > { %1093 = vsyncadd (%p1676_p1), %s296_s19, 4294967168  ;;  %p1677_p4 = scmp.ne.s32.totalorder %s1661_s29, 0 }
  0x81   : > { %1095 = dma.done.wait (%p1677_p4), [#allocation5], 64  }
  0x82   : > { %1097 = vsyncadd (%p1677_p4), [#allocation5], 4294967232 }
  0x83   : > { %1099 = dma.done.wait (%p1677_p4), [#allocation6], 16  }
  0x84   : > { %1101 = vsyncadd (%p1677_p4), [#allocation6], 4294967280 }
  0x85   : > { %1103 = dma.done.wait (%p1677_p4), [#allocation10], 80  }
  0x86   : > { %1105 = vsyncadd (%p1677_p4), [#allocation10], 4294967216 }
  0x87   : > { %320 = sfence }
  0x88   : > { %s350_s7 = sld [smem:[#allocation7]]  ;;  %s749_s12 = sld [smem:[#allocation7 + $0x1]]  ;;  %v1394_v0 = vld [vmem:[%s299_s27] sm:$0x3]  ;;  %v1398_v1 = vld [vmem:[%s299_s27 + $0x2] sm:$0x3] }
  0x89   : > { %s750_s14 = sld [smem:[#allocation7 + $0x2]]  ;;  %s751_s15 = sld [smem:[#allocation7 + $0x3]]  ;;  %v1400_v2 = vld [vmem:[%s299_s27 + $0x4] sm:$0x3]  ;;  %v1408_v4 = vld [vmem:[%s299_s27 + $0x6] sm:$0x3] }
  0x8a   : > { %s752_s17 = sld [smem:[#allocation7 + $0x80]]  ;;  %s753_s10 = sld [smem:[#allocation7 + $0x81]]  ;;  %v1145_v46 = vmov 0.0  }
  0x8b   : > { %s1396_s18 = sld [smem:[#allocation8]]  ;;  %s1402_s20 = sld [smem:[#allocation7 + $0x82]] }
  0x8c   : > { %s755_s9 = sld [smem:[#allocation7 + $0x83]]  ;;  %s1404_s29 = sld [smem:[#allocation8 + $0x1]] }
  0x8d   : > { %s1406_s19 = sld [smem:[#allocation7 + $0x100]]  ;;  %s1411_s0 = sld [smem:[#allocation7 + $0x101]] }
  0x8e   : > { %v397_v3 = vstv %s350_s7  ;;  %v399_v6 = vstv %s749_s12  ;;  %s1413_s1 = sld [smem:[#allocation7 + $0x102]]  ;;  %s1417_s7 = sld [smem:[#allocation7 + $0x103]] }
  0x8f   : > { %v398_v5 = vmul.f32 %v397_v3, %v1394_v0  ;;  %v402_v7 = vstv %s750_s14  ;;  %v400_v8 = vmul.f32 %v1398_v1, %v399_v6  ;;  %v405_v10 = vstv %s751_s15  ;;  %s1419_s27 = sld [smem:[#allocation7 + $0x180]]  ;;  %s1421_s2 = sld [smem:[#allocation7 + $0x181]] }
  0x90   : > { %v403_v9 = vmul.f32 %v1400_v2, %v402_v7  ;;  %v415_v11 = vstv %s752_s17  ;;  %v406_v13 = vmul.f32 %v1408_v4, %v405_v10  ;;  %v417_v15 = vstv %s753_s10  ;;  %s1425_s12 = sld [smem:[#allocation7 + $0x182]]  ;;  %s1427_s14 = sld [smem:[#allocation7 + $0x183]] }
  0x91   : > { %v401_v12 = vadd.f32 %v400_v8, %v398_v5  ;;  %v416_v14 = vmul.f32 %v415_v11, %v1394_v0  ;;  %v418_v16 = vmul.f32 %v1398_v1, %v417_v15  ;;  %v420_v17 = vstv %s1402_s20  ;;  %s1431_s15 = sld [smem:[#allocation8 + $0x2]]  ;;  %s1436_s17 = sld [smem:[#allocation8 + $0x3]] }
  0x92   : > { %v423_v18 = vstv %s755_s9  ;;  %v408_v20 = vstv %s1396_s18  ;;  %v421_v21 = vmul.f32 %v1400_v2, %v420_v17  ;;  %s1438_s10 = sld [smem:[#allocation9]]  ;;  %s1443_s20 = sld [smem:[#allocation9 + $0x1]]  ;;  %v426_v32 = vstv %s1404_s29 }
  0x93   : > { %v404_v19 = vadd.f32 %v403_v9, %v401_v12  ;;  %v424_v22 = vmul.f32 %v1408_v4, %v423_v18  ;;  %v419_v23 = vadd.f32 %v418_v16, %v416_v14  ;;  %v434_v24 = vstv %s1406_s19  ;;  %s1445_s9 = sld [smem:[#allocation9 + $0x2]]  ;;  %s1450_s18 = sld [smem:[#allocation9 + $0x3]] }
  0x94   : > { %v436_v25 = vstv %s1411_s0  ;;  %v439_v26 = vstv %s1413_s1  ;;  %v435_v28 = vmul.f32 %v434_v24, %v1394_v0  ;;  %v442_v33 = vstv %s1417_s7  ;;  %s1455_s0 = sld [smem:[#allocation9 + $0x80]]  ;;  %s1461_s19 = sld [smem:[#allocation9 + $0x81]] }
  0x95   : > { %v407_v27 = vadd.f32 %v406_v13, %v404_v19  ;;  %v437_v29 = vmul.f32 %v1398_v1, %v436_v25  ;;  %v440_v30 = vmul.f32 %v1400_v2, %v439_v26  ;;  %v422_v31 = vadd.f32 %v421_v21, %v419_v23  ;;  %s1459_s1 = sld [smem:[#allocation11]]  ;;  %s1466_s29 = sld [smem:[#allocation9 + $0x82]] }
  0x96   : > { %v453_v34 = vstv %s1419_s27  ;;  %v443_v37 = vmul.f32 %v1408_v4, %v442_v33  ;;  %v455_v40 = vstv %s1421_s2  ;;  %v458_v41 = vstv %s1425_s12  ;;  %s1469_s7 = scalar_lea.vmem [#allocation12], %s1374_s11  ;;  %s1474_s27 = sld [smem:[#allocation9 + $0x83]] }
  0x97   : > { %v409_v35 = vadd.f32 %v408_v20, %v407_v27  ;;  %v438_v36 = vadd.f32 %v437_v29, %v435_v28  ;;  %v454_v38 = vmul.f32 %v453_v34, %v1394_v0  ;;  %v425_v39 = vadd.f32 %v424_v22, %v422_v31  ;;  %s1476_s2 = sld [smem:[#allocation9 + $0x100]]  ;;  %s1480_s12 = sld [smem:[#allocation9 + $0x101]] }
  0x98   : > { %v461_v42 = vstv %s1427_s14  ;;  %v456_v44 = vmul.f32 %v1398_v1, %v455_v40  ;;  %v459_v45 = vmul.f32 %v1400_v2, %v458_v41  ;;  %v445_v49 = vstv %s1431_s15  ;;  %s551_s14 = sshll.u32 %s1469_s7, 4  ;;  %s1487_s3 = sld [smem:[#allocation11 + $0x1]]  ;;  %s1511_s14 = int_to_ptr.vmem [resolvable:$true] %s551_s14 }
  0x99   : > { %410 = vst [vmem:[%s1469_s7] sm:$0x3] %v409_v35  ;;  %vm411_vm0 = vcmp.gt.f32.partialorder %v409_v35, 0.0  ;;  %v441_v43 = vadd.f32 %v440_v30, %v438_v36  ;;  %v427_v48 = vadd.f32 %v426_v32, %v425_v39  ;;  %v462_v50 = vmul.f32 %v1408_v4, %v461_v42  ;;  %s1493_s15 = sld [smem:[#allocation9 + $0x102]]  ;;  %s1495_s4 = sld [smem:[#allocation9 + $0x103]] }
  0x9a   : > { %v788_v47 = vsel %vm411_vm0, 1.0, %v1145_v46  ;;  %v457_v53 = vadd.f32 %v456_v44, %v454_v38  ;;  %v472_v54 = vstv %s1438_s10  ;;  %v464_v55 = vstv %s1436_s17  ;;  %s1498_s10 = sld [smem:[#allocation9 + $0x180]]  ;;  %s1500_s16 = sld [smem:[#allocation9 + $0x181]] }
  0x9b   : > { %v1483_v51 = vmul.f32 %v788_v47, %v1394_v0  ;;  %v444_v52 = vadd.f32 %v443_v37, %v441_v43  ;;  %789 = vst [vmem:[%s1469_s7 + $0x2] sm:$0x3] %v427_v48  ;;  %vm430_vm1 = vcmp.gt.f32.partialorder %v427_v48, 0.0  ;;  %v474_v56 = vstv %s1443_s20  ;;  %s1508_s17 = sld [smem:[#allocation9 + $0x182]]  ;;  %s807_s20 = sshll.u32 %s1128_s24, 7 }
  0x9c   : > { %v477_v57 = vstv %s1445_s9  ;;  %v790_v58 = vsel %vm430_vm1, 1.0, %v1145_v46  ;;  %v460_v60 = vadd.f32 %v459_v45, %v457_v53  ;;  %v480_v61 = vstv %s1450_s18  ;;  %s1519_s9 = sld [smem:[#allocation11 + $0x2]]  ;;  %s1531_s28 = scalar_lea.hbm %s1647_s5, %s807_s20 }
  0x9d   : > { %v446_v59 = vadd.f32 %v445_v49, %v444_v52  ;;  %v1503_v62 = vmul.f32 %v790_v58, %v1398_v1  ;;  %v473_v63 = vmul.f32 %v472_v54, %v1483_v51  ;;  %v486_v0 = vstv %s1455_s0  ;;  %s1521_s0 = sld [smem:[#allocation9 + $0x183]]  ;;  %p1678_p10 = scmp.ne.s32.totalorder %s1672_s13, 0 }
  0x9e   : > { %v488_v3 = vstv %s1461_s19  ;;  %v463_v5 = vadd.f32 %v462_v50, %v460_v60  ;;  %v483_v6 = vstv %s1459_s1  ;;  %v487_v1 = vmul.f32 %v486_v0, %v1483_v51  ;;  %s1540_s25 = sld [smem:[#allocation11 + $0x3]] }
  0x9f   : > { %791 = vst [vmem:[%s1469_s7 + $0x4] sm:$0x3] %v446_v59  ;;  %vm449_vm2 = vcmp.gt.f32.partialorder %v446_v59, 0.0  ;;  %v475_v8 = vmul.f32 %v474_v56, %v1503_v62  ;;  %v489_v9 = vmul.f32 %v488_v3, %v1503_v62  ;;  %v491_v10 = vstv %s1466_s29  ;;  %s532_s29 = scalar_lea.sflag [#allocation4], %s1371_s30 }
  0xa0   : > { %v792_v7 = vsel %vm449_vm2, 1.0, %v1145_v46  ;;  %v465_v12 = vadd.f32 %v464_v55, %v463_v5  ;;  %v494_v13 = vstv %s1474_s27  ;;  %v501_v14 = vstv %s1476_s2  ;;  %s1146_s27 = smov [#allocation12]  }
  0xa1   : > { %v452_v11 = vmul.f32 %v792_v7, %v1400_v2  ;;  %v476_v15 = vadd.f32 %v475_v8, %v473_v63  ;;  %v490_v16 = vadd.f32 %v489_v9, %v487_v1  ;;  %v502_v17 = vmul.f32 %v501_v14, %v1483_v51  ;;  %s1014_s2 = sshll.u32 %s1146_s27, 4  ;;  %s1015_s2 = int_to_ptr.vmem [resolvable:$false] %s1014_s2 }
  0xa2   : > { %v503_v18 = vstv %s1480_s12  ;;  %793 = vst [vmem:[%s1469_s7 + $0x6] sm:$0x3] %v465_v12  ;;  %vm468_vm3 = vcmp.gt.f32.partialorder %v465_v12, 0.0  ;;  %v497_v22 = vstv %s1487_s3  ;;  %v506_v23 = vstv %s1493_s15  ;;  %s1010_s7 = scalar_lea.vmem %s1511_s14, 128  ;;  %s1016_s3 = scalar_lea.vmem %s1015_s2, 256 }
  0xa3   : > { %v478_v2 = vmul.f32 %v477_v57, %v452_v11  ;;  %v492_v19 = vmul.f32 %v491_v10, %v452_v11  ;;  %v504_v20 = vmul.f32 %v503_v18, %v1503_v62  ;;  %v794_v21 = vsel %vm468_vm3, 1.0, %v1145_v46  ;;  %p1011_p8 = scmp.ne.s32.totalorder %s1511_s14, %s1010_s7  ;;  %p1017_p13 = scmp.lt.s32.totalorder %s1511_s14, %s1015_s2 }
  0xa4   : > { %v509_v24 = vstv %s1495_s4  ;;  %v471_v25 = vmul.f32 %v794_v21, %v1408_v4  ;;  %p1018_p5 = scmp.lt.s32.totalorder %s1016_s3, %s1010_s7 }
  0xa5   : > { %v479_v26 = vadd.f32 %v478_v2, %v476_v15  ;;  %v493_v27 = vadd.f32 %v492_v19, %v490_v16  ;;  %v505_v28 = vadd.f32 %v504_v20, %v502_v17  ;;  %p1012_p2 = pnand %p1011_p8, %p1678_p10 }
  0xa6   : > { %p1019_p7 = por %p1018_p5, %p1017_p13 }
  0xa7   : > { %p1013_p12 = pneg %p1012_p2 }
  0xa9   : > { %p1020_p11 = pnand %p1019_p7, %p1013_p12 }
  0xab   : > { %1023 = shalt.err (!%p1020_p11)
}
  0xac   : > { %s1024_s4 = scalar_lea.hbm %s1531_s28, 128  ;;  %s1028_s19 = scalar_lea.hbm %s1647_s5, 256 }
  0xad   : > { %p1025_p0 = scmp.ne.s32.totalorder %s1531_s28, %s1024_s4  ;;  %p1029_p6 = scmp.lt.u32.totalorder %s1531_s28, %s1647_s5 }
  0xae   : > { %p1030_p1 = scmp.lt.u32.totalorder %s1028_s19, %s1024_s4  ;;  %p1032_p8 = scmp.lt.u32.totalorder %s1024_s4, %s1531_s28 }
  0xaf   : > { %p1026_p9 = pnand %p1025_p0, %p1678_p10 }
  0xb0   : > { %p1031_p4 = por %p1030_p1, %p1029_p6 }
  0xb1   : > { %p1027_p3 = pneg %p1026_p9 }
  0xb2   : > { %p1033_p2 = por %p1032_p8, %p1031_p4 }
  0xb4   : > { %p1034_p12 = pnand %p1033_p2, %p1027_p3 }
  0xb6   : > { %1037 = shalt.err (!%p1034_p12)
}
  0xb7   : > { %s1147_s7 = smov 32   ;;  %s1148_s3 = smov 2   ;;  %v507_v4 = vmul.f32 %v506_v23, %v452_v11  ;;  %v516_v29 = vstv %s1498_s10  ;;  %v518_v30 = vstv %s1500_s16  ;;  %v521_v31 = vstv %s1508_s17 }
  0xb8   : > { %827 = dma.vmem_to_hbm [thread:$0]  (%p1678_p10), %s1511_s14, 128, %s1531_s28, %s532_s29, %s1147_s7, %s1147_s7, %s1148_s3   ;;  %v481_v32 = vmul.f32 %v480_v61, %v471_v25  ;;  %v495_v33 = vmul.f32 %v494_v13, %v471_v25  ;;  %v510_v34 = vmul.f32 %v509_v24, %v471_v25  ;;  %v517_v35 = vmul.f32 %v516_v29, %v1483_v51 }
  0xb9   : > { %v508_v36 = vadd.f32 %v507_v4, %v505_v28  ;;  %v519_v37 = vmul.f32 %v518_v30, %v1503_v62  ;;  %v522_v38 = vmul.f32 %v521_v31, %v452_v11  ;;  %v524_v39 = vstv %s1521_s0  ;;  %s349_s16 = scalar_lea.vmem [#allocation13], %s1374_s11  ;;  %s1590_s11 = scalar_lea.hbm %s1648_s6, %s807_s20 }
  0xba   : > { %v482_v40 = vadd.f32 %v481_v32, %v479_v26  ;;  %v496_v41 = vadd.f32 %v495_v33, %v493_v27  ;;  %v512_v42 = vstv %s1519_s9  ;;  %v525_v45 = vmul.f32 %v524_v39, %v471_v25  ;;  %s568_s28 = sshll.u32 %s349_s16, 4  ;;  %s537_s14 = scalar_lea.sflag [#allocation14], %s1371_s30  ;;  %s1583_s28 = int_to_ptr.vmem [resolvable:$true] %s568_s28 }
  0xbb   : > { %v511_v43 = vadd.f32 %v510_v34, %v508_v36  ;;  %v520_v44 = vadd.f32 %v519_v37, %v517_v35  ;;  %v527_v50 = vstv %s1540_s25  ;;  %s1038_s10 = scalar_lea.vmem %s1583_s28, 128  ;;  %s1149_s17 = smov [#allocation13]  }
  0xbc   : > { %v484_v46 = vadd.f32 %v483_v6, %v482_v40  ;;  %v498_v47 = vadd.f32 %v497_v22, %v496_v41  ;;  %p1039_p13 = scmp.ne.s32.totalorder %s1583_s28, %s1038_s10  ;;  %s1042_s9 = sshll.u32 %s1149_s17, 4  ;;  %s1043_s9 = int_to_ptr.vmem [resolvable:$false] %s1042_s9 }
  0xbd   : > { %v513_v48 = vadd.f32 %v512_v42, %v511_v43  ;;  %v523_v49 = vadd.f32 %v522_v38, %v520_v44  ;;  %s1044_s0 = scalar_lea.vmem %s1043_s9, 256  ;;  %p1045_p11 = scmp.lt.s32.totalorder %s1583_s28, %s1043_s9 }
  0xbe   : > { %485 = vst [vmem:[%s349_s16] sm:$0x3] %v484_v46  ;;  %795 = vst [vmem:[%s349_s16 + $0x2] sm:$0x3] %v498_v47  ;;  %p1040_p5 = pnand %p1039_p13, %p1678_p10  ;;  %p1046_p0 = scmp.lt.s32.totalorder %s1044_s0, %s1038_s10 }
  0xbf   : > { %796 = vst [vmem:[%s349_s16 + $0x4] sm:$0x3] %v513_v48  ;;  %v526_v51 = vadd.f32 %v525_v45, %v523_v49 }
  0xc0   : > { %p1041_p7 = pneg %p1040_p5  ;;  %p1047_p9 = por %p1046_p0, %p1045_p11 }
  0xc1   : > { %v528_v52 = vadd.f32 %v527_v50, %v526_v51 }
  0xc2   : > { %p1048_p3 = pnand %p1047_p9, %p1041_p7 }
  0xc3   : > { %797 = vst [vmem:[%s349_s16 + $0x6] sm:$0x3] %v528_v52 }
  0xc4   : > { %1051 = shalt.err (!%p1048_p3)
}
  0xc5   : > { %s1052_s24 = scalar_lea.hbm %s1590_s11, 128  ;;  %s1056_s29 = scalar_lea.hbm %s1648_s6, 256 }
  0xc6   : > { %p1053_p6 = scmp.ne.s32.totalorder %s1590_s11, %s1052_s24  ;;  %p1057_p8 = scmp.lt.u32.totalorder %s1590_s11, %s1648_s6 }
  0xc7   : > { %p1058_p2 = scmp.lt.u32.totalorder %s1056_s29, %s1052_s24  ;;  %p1060_p13 = scmp.lt.u32.totalorder %s1052_s24, %s1590_s11 }
  0xc8   : > { %p1054_p1 = pnand %p1053_p6, %p1678_p10 }
  0xc9   : > { %p1059_p12 = por %p1058_p2, %p1057_p8 }
  0xca   : > { %p1055_p4 = pneg %p1054_p1 }
  0xcb   : > { %p1061_p5 = por %p1060_p13, %p1059_p12 }
  0xcd   : > { %p1062_p7 = pnand %p1061_p5, %p1055_p4 }
  0xcf   : > { %1065 = shalt.err (!%p1062_p7)
}
  0xd0   : > { %828 = dma.vmem_to_hbm [thread:$0]  (%p1678_p10), %s1583_s28, 128, %s1590_s11, %s537_s14, %s1147_s7, %s1147_s7, %s1148_s3  }
  0xd1 PF: > { %s583_s15 = sand.u32 1, %s1116_s21   ;;  %p1679_p11 = scmp.ne.s32.totalorder %s1664_s8, 0 }
  0xd2   : > { %p1680_p0 = scmp.ge.s32.totalorder %s1136_s26, 2  ;;  %s584_s19 = scalar_lea.sflag [#allocation4], %s583_s15 }
  0xd4   : > { %p849_p9 = pnand %p1680_p0, %p1679_p11 }
  0xd6   : > { %1107 = dma.done.wait (!%p849_p9), %s584_s19, 128  }
  0xd7   : > { %1109 = vsyncadd (!%p849_p9), %s584_s19, 4294967168  ;;  %s593_s13 = scalar_lea.sflag [#allocation14], %s583_s15 }
  0xd8   : > { %1111 = dma.done.wait (!%p849_p9), %s593_s13, 128  }
  0xd9   : > { %1113 = vsyncadd (!%p849_p9), %s593_s13, 4294967168  ;;  %s29_s26 = sadd.s32 1, %s1136_s26   ;;  %s1681_s30 = sld [smem:[#allocation23_spill]] }
  0xda   : > { %p26_p3 = scmp.ge.s32.totalorder %s29_s26, 4   ;;  %s1682_s24 = sld [smem:[#allocation21_spill]] }
  0xdb   : > { %s1683_s25 = sld [smem:[#allocation22_spill]]  ;;  %s1684_s21 = smov %s1120_s22 }
  0xdc   : > { %s1685_s22 = smov %s1124_s23  ;;  %28 = sbr.rel (!%p26_p3) target bundleno = 17 (0x11), region = 129 }
  0xdf   : > { %s1686_s23 = smov %s1681_s30 }
  0xe3   :  { %598 = vsyncpa [#allocation3], 1 }
  0xe4   :  { %600 = vsyncpa [#allocation3 + $0x1], 1 }
  0xe5   :  { %601 = vsyncpa [#allocation4], 1 }
  0xe6   :  { %603 = vsyncpa [#allocation4 + $0x1], 1 }
  0xe7   :  { %604 = vsyncpa [#allocation14], 1 }
  0xe8   :  { %606 = vsyncpa [#allocation14 + $0x1], 1 }
  0xe9   :  { %607 = vsyncpa [#allocation5], 1 }
  0xea   :  { %609 = vsyncpa [#allocation5 + $0x1], 1 }
  0xeb   :  { %610 = vsyncpa [#allocation6], 1 }
  0xec   :  { %612 = vsyncpa [#allocation6 + $0x1], 1 }
  0xed   :  { %613 = vsyncpa [#allocation10], 1 }

</bundles_post_ra>
